<compile_context>
chip_gen: v7x
topology: tpu7x:2x2x1
jax: 0.10.0
libtpu: 0.0.40
codegen_flags: <defaults>
</compile_context>

<pallas_src>
import jax
import jax.numpy as jnp
from jax import lax
from jax.experimental import pallas as pl
from jax.experimental.pallas import tpu as pltpu


def _round_up(x, m):
    return ((x + m - 1) // m) * m


# ---------------------------------------------------------------------------
# Generic gather path: output rows = weight[flat_indices]
# ---------------------------------------------------------------------------
def _gather_tile_kernel(idx_ref, w_ref, o_ref):
    """One-hot MXU gather for one row tile.

    idx_ref: VMEM (rows_tile, 1) int32  — flat indices for this tile.
    w_ref:   VMEM (V, D)                — whole embedding table (resident).
    o_ref:   VMEM (rows_tile, D)        — output slab for this grid step.
    """
    rows_tile = o_ref.shape[0]
    v_total = w_ref.shape[0]

    # Clamp for robustness: OOB VMEM reads are unchecked on TPU.
    idx = jnp.clip(idx_ref[...], 0, v_total - 1)               # (rows_tile, 1)

    # (rows_tile, V) one-hot built on the VPU.
    col = lax.broadcasted_iota(jnp.int32, (rows_tile, v_total), 1)
    one_hot = (col == idx).astype(w_ref.dtype)

    # Single MXU push per tile; exact for f32 weights (1.0/0.0 multiplies).
    o_ref[...] = jnp.dot(
        one_hot, w_ref[...], preferred_element_type=jnp.float32
    ).astype(o_ref.dtype)


def _choose_rows_tile(n_rows, token_dim, table_bytes, itemsize,
                      target_slab_bytes=4 << 20,
                      vmem_budget_bytes=12 << 20):
    """Pick the output row tile.

    Budget (conservative, fits v5e's 16 MiB default scoped VMEM):
        2 * rows * D * itemsize     (double-buffered output slab)
      + 2 * table_bytes             (double-buffered resident (V, D) table)
      + small index block / internal scratch headroom
    Target slab ~4 MiB so the ~0.35 us/step grid overhead is amortized.
    """
    row_bytes = token_dim * itemsize
    avail = max(vmem_budget_bytes - 2 * table_bytes, 2 * 8 * row_bytes)
    cap = max(8, (avail // (2 * row_bytes)) // 8 * 8)
    target = max(8, (target_slab_bytes // row_bytes) // 8 * 8)
    rows = min(target, cap, _round_up(n_rows, 8))
    return max(8, (rows // 8) * 8)


def prompt_embedding_forward(indices, weight):
    """Pallas implementation of PromptEmbedding.forward (generic gather).

    indices: (B, T) integer array of virtual-token indices.
    weight:  (V, D) float32 embedding table.
    returns: (B, T, D) float32 prompt embeddings == weight[indices].
    """
    B, T = indices.shape
    V, D = weight.shape
    N = B * T
    itemsize = jnp.dtype(weight.dtype).itemsize
    table_bytes = V * D * itemsize

    rows_tile = _choose_rows_tile(N, D, table_bytes, itemsize)
    N_pad = _round_up(N, rows_tile)

    flat_idx = indices.reshape(-1).astype(jnp.int32)
    if N_pad != N:
        # Padded rows gather row 0 (always valid) and are sliced off below.
        flat_idx = jnp.concatenate(
            [flat_idx, jnp.zeros((N_pad - N,), jnp.int32)])
    flat_idx = flat_idx.reshape(N_pad, 1)

    out_flat = pl.pallas_call(
        _gather_tile_kernel,
        out_shape=jax.ShapeDtypeStruct((N_pad, D), weight.dtype),
        grid=(N_pad // rows_tile,),
        in_specs=[
            # Index column for this tile.
            pl.BlockSpec((rows_tile, 1), lambda i: (i, 0)),
            # Whole table, constant block index -> fetched once, kept resident.
            pl.BlockSpec((V, D), lambda i: (0, 0)),
        ],
        # Sublane/lane-dense output slab: rows_tile (multiple of 8) x D.
        out_specs=pl.BlockSpec((rows_tile, D), lambda i: (i, 0)),
        compiler_params=pltpu.CompilerParams(
            dimension_semantics=("parallel",),   # independent tiles; v7x 2 TCs
        ),
    )(flat_idx, weight)

    return out_flat[:N].reshape(B, T, D)


# ---------------------------------------------------------------------------
# PEFT fast path: indices are tile(arange(T), (batch, 1)) -> pure broadcast.
# ---------------------------------------------------------------------------
def _broadcast_tile_kernel(w_ref, o_ref):
    o_ref[...] = jnp.broadcast_to(w_ref[...][None, :, :], o_ref.shape)


def _choose_batch_tile(batch, v, d, itemsize,
                       target_bytes=2 << 20, vmem_budget_bytes=12 << 20):
    block_bytes = max(1, v * d * itemsize)
    max_bt = min(batch,
                 max(1, target_bytes // block_bytes),
                 max(1, vmem_budget_bytes // (2 * block_bytes)))
    bt = 1
    for c in range(1, int(max_bt) + 1):   # largest divisor of batch <= max_bt
        if batch % c == 0:
            bt = c
    return bt


def prompt_embedding_forward_arange(weight, batch):
    """Fast path for the actual PEFT call pattern: broadcast the table over batch.

    NOTE: assumes indices == tile(arange(total_virtual_tokens), (batch, 1)).
    """
    V, D = weight.shape
    itemsize = jnp.dtype(weight.dtype).itemsize
    bt = _choose_batch_tile(batch, V, D, itemsize)

    return pl.pallas_call(
        _broadcast_tile_kernel,
        out_shape=jax.ShapeDtypeStruct((batch, V, D), weight.dtype),
        grid=(batch // bt,),
        in_specs=[pl.BlockSpec((V, D), lambda b: (0, 0))],      # resident table
        out_specs=pl.BlockSpec((bt, V, D), lambda b: (b, 0, 0)),
        compiler_params=pltpu.CompilerParams(
            dimension_semantics=("parallel",),
        ),
    )(weight)


def make_prompt_embedding_params(total_virtual_tokens, token_dim, key):
    """Stand-in for torch.nn.Embedding(V, D) init: N(0, 1), float32."""
    # TODO(synk): PromptTuningInit.TEXT (tokenizer + base-model word embeddings)
    # is a checkpoint/tokenizer dependency, not a kernel op; RANDOM init used.
    return jax.random.normal(key, (total_virtual_tokens, token_dim), jnp.float32)


if __name__ == "__main__":
    key = jax.random.PRNGKey(0)
    k_w, _ = jax.random.split(key)

    # Small shapes consistent with the module: num_virtual_tokens=8,
    # num_transformer_submodules=1, token_dim=128, batch=2.
    num_virtual_tokens = 8
    num_transformer_submodules = 1
    total_virtual_tokens = num_virtual_tokens * num_transformer_submodules
    token_dim = 128
    batch = 2

    weight = make_prompt_embedding_params(total_virtual_tokens, token_dim, k_w)

    # PEFT calls forward with indices = arange(total_virtual_tokens) tiled
    # over the batch; build them that way (deterministic).
    indices = jnp.tile(
        jnp.arange(total_virtual_tokens, dtype=jnp.int32)[None, :], (batch, 1)
    )

    ref = weight[indices]

    # Generic gather path.
    out = prompt_embedding_forward(indices, weight)
    out = jax.block_until_ready(out)
    assert out.shape == (batch, total_virtual_tokens, token_dim)
    assert out.dtype == jnp.float32
    assert jnp.array_equal(out, ref), "Pallas gather mismatch vs reference"

    # PEFT arange-broadcast fast path.
    out_fast = prompt_embedding_forward_arange(weight, batch)
    out_fast = jax.block_until_ready(out_fast)
    assert jnp.array_equal(out_fast, ref), "Pallas broadcast fast path mismatch"

    print("KERNEL_OK")
</pallas_src>

<mosaic_0001>
module attributes {stable_mosaic.version = 11 : i64} {
  func.func @_gather_tile_kernel(%arg0: i32, %arg1: memref<16x1xi32, #tpu.memory_space<vmem>>, %arg2: memref<8x128xf32, #tpu.memory_space<vmem>>, %arg3: memref<16x128xf32, #tpu.memory_space<vmem>>) attributes {dimension_semantics = [#tpu.dimension_semantics<parallel>], iteration_bounds = array<i64: 1>, scalar_prefetch = 0 : i64, scratch_operands = 0 : i64, tpu.core_type = #tpu.core_type<tc>, window_params = [{transform_indices = @transform_0, window_bounds = array<i64: 16, 1>}, {pipeline_mode = #tpu.pipeline_mode<synchronous>, transform_indices = @transform_1, window_bounds = array<i64: 8, 128>}, {transform_indices = @transform_2, window_bounds = array<i64: 16, 128>}]} {
    %c0 = arith.constant 0 : index
    %c0_0 = arith.constant 0 : index
    %0 = vector.load %arg1[%c0, %c0_0] : memref<16x1xi32, #tpu.memory_space<vmem>>, vector<16x1xi32>
    %c0_i32 = arith.constant 0 : i32
    %c7_i32 = arith.constant 7 : i32
    %1 = vector.broadcast %c0_i32 : i32 to vector<16x1xi32>
    %2 = arith.maxsi %1, %0 : vector<16x1xi32>
    %3 = vector.broadcast %c7_i32 : i32 to vector<16x1xi32>
    %4 = arith.minsi %3, %2 : vector<16x1xi32>
    %5 = tpu.iota {dimensions = array<i32: 1>} : vector<16x8xi32>
    %6 = vector.broadcast %4 : vector<16x1xi32> to vector<16x8xi32>
    %7 = arith.cmpi eq, %5, %6 : vector<16x8xi32>
    %8 = arith.extui %7 : vector<16x8xi1> to vector<16x8xi32>
    %9 = arith.sitofp %8 : vector<16x8xi32> to vector<16x8xf32>
    %c0_1 = arith.constant 0 : index
    %c0_2 = arith.constant 0 : index
    %10 = vector.load %arg2[%c0_1, %c0_2] : memref<8x128xf32, #tpu.memory_space<vmem>>, vector<8x128xf32>
    %cst = arith.constant dense<0.000000e+00> : vector<16x128xf32>
    %11 = tpu.matmul %9, %10, %cst {dimension_numbers = #tpu.dot_dimension_numbers<[1], [0], [0], [1], [0, 0, 1, 1], [], []>} : vector<16x8xf32>, vector<8x128xf32>, vector<16x128xf32> -> vector<16x128xf32>
    %c0_3 = arith.constant 0 : index
    %c0_4 = arith.constant 0 : index
    %12 = vector.load %arg3[%c0_3, %c0_4] : memref<16x128xf32, #tpu.memory_space<vmem>>, vector<16x128xf32>
    tpu.vector_store %arg3[%c0_3, %c0_4], %11 {strides = array<i32>} : memref<16x128xf32, #tpu.memory_space<vmem>>, vector<16x128xf32>,
    return
  }
  func.func @transform_0(%arg0: i32) -> (i32, i32) {
    %c0_i32 = arith.constant 0 : i32
    %c0_i32_0 = arith.constant 0 : i32
    return %arg0, %c0_i32 : i32, i32
  }
  func.func @transform_1(%arg0: i32) -> (i32, i32) {
    %c0_i32 = arith.constant 0 : i32
    %c0_i32_0 = arith.constant 0 : i32
    %c0_i32_1 = arith.constant 0 : i32
    return %c0_i32, %c0_i32_0 : i32, i32
  }
  func.func @transform_2(%arg0: i32) -> (i32, i32) {
    %c0_i32 = arith.constant 0 : i32
    %c0_i32_0 = arith.constant 0 : i32
    return %arg0, %c0_i32 : i32, i32
  }
}

</mosaic_0001>

<bundles_post_ra>
// kernel: tpu_custom_call.1
= control target key start
LH: loop header
LB: loop body
LE: loop exit
PB: predicated region body
PF: predicated region fallthrough
CT: control target
= control target key end

     0   :  { %s220_s0 = inlined_call_operand.vmem [shape: s32[16,1], index: 0, kind: input, shape index: {}]   ;;  %s221_s1 = inlined_call_operand.vmem [shape: f32[8,128], index: 1, kind: input, shape index: {}]   ;;  %s222_s2 = inlined_call_operand.hbm [shape: f32[16,128], index: 2, kind: output, shape index: {}]  }
   0x1   :  { %v12_v0 = vld [vmem:[%s220_s0] sm:$0xff]  ;;  %v13_v1 = vld [vmem:[%s220_s0 + $0x8] sm:$0xff] }
   0x2   :  { %7 = vsyncpa [#allocation3], 0  ;;  %v179_v2 = vmov 0   ;;  %vm14_vm0 = vcmp.gt.s32.totalorder %v12_v0, 0  ;;  %vm16_vm1 = vcmp.gt.s32.totalorder %v13_v1, 0  ;;  %v36_v7 = vld [vmem:[%s221_s1] sm:$0xff]  ;;  %v22_v8 = vlaneseq }
   0x3   :  { %154 = vset.pattern.permute.xlu0 %v179_v2  ;;  %v15_v3 = vsel %vm14_vm0, %v12_v0, 0  ;;  %v17_v4 = vsel %vm16_vm1, %v13_v1, 0  ;;  %144 = vmatprep.subr.mxu0 %v36_v7  ;;  %vm37_vm4 = vcmask 64512   ;;  %v180_v11 = vmov 0.0   ;;  %s181_s0 = smov [#allocation2]  }
   0x4   :  { %vm18_vm2 = vcmp.lt.s32.totalorder %v15_v3, 7  ;;  %vm20_vm3 = vcmp.lt.s32.totalorder %v17_v4, 7  ;;  %145 = vmatpush3.msra.mxu0 %v36_v7  ;;  %v23_v9 = vand.u32 127, %v22_v8  ;;  %s126_s15 = sshll.u32 %s181_s0, 4  ;;  %s127_s15 = int_to_ptr.vmem [resolvable:$true] %s126_s15 }
   0x5   :  { %v19_v5 = vsel %vm18_vm2, %v15_v3, 7  ;;  %v21_v6 = vsel %vm20_vm3, %v17_v4, 7  ;;  %s155_s1 = scalar_lea.vmem %s127_s15, 256  ;;  %p160_p1 = scmp.lt.s32.totalorder %s127_s15, %s127_s15 }
   0x6   :  { %25 = vperm.xlu0 %154, %v19_v5   ;;  %p156_p0 = scmp.ne.s32.totalorder %s127_s15, %s155_s1  ;;  %p161_p2 = scmp.lt.s32.totalorder %s155_s1, %s155_s1 }
   0x8   :  { %p162_p3 = por %p161_p2, %p160_p1 }
   0xa   :  { %28 = vperm.xlu0 %154, %v21_v6   ;;  %p163_p4 = pnand %p162_p3, %p156_p0 }
  0x85   :  { %v26_v10 = vpop.permute.xlu0 %25 }
  0x86   :  { %vm30_vm5 = vcmp.eq.s32.totalorder %v23_v9, %v26_v10 }
  0x87   :  { %v137_v12 = vsel %vm30_vm5, 1.0, %v180_v11 }
  0x88   :  { %146 = vmatprep.mubr.msk.f32.mxu0 %vm37_vm4, %v137_v12 }
  0x89   :  { %v29_v13 = vpop.permute.xlu0 %28 }
  0x8a   :  { %vm31_vm6 = vcmp.eq.s32.totalorder %v23_v9, %v29_v13 }
  0x8b   :  { %v138_v14 = vsel %vm31_vm6, 1.0, %v180_v11 }
  0x8c   :  { %147 = vmatmul.mubr.msk.f32.vlgmr.msra.gmra.mrb[0].mxu0 %vm37_vm4, %v138_v14 }
 0x15f   :  { %v148_v15 = vpop.f32.mrb[0].mxu0 }
 0x160   :  { %120 = vst [vmem:[#allocation2 + $0x8] sm:$0xff] %v148_v15  ;;  %v110_v16 = vpop.f32.mrb[1].mxu0 }
 0x161   :  { %119 = vst [vmem:[#allocation2] sm:$0xff] %v110_v16 }
 0x162   :  { %166 = shalt.err (!%p163_p4)
}
 0x163   :  { %s167_s18 = scalar_lea.hbm %s222_s2, 256 }
 0x164   :  { %p168_p5 = scmp.ne.s32.totalorder %s222_s2, %s167_s18  ;;  %p171_p6 = scmp.lt.u32.totalorder %s167_s18, %s222_s2 }
 0x166   :  { %p173_p7 = pnand %p171_p6, %p168_p5 }
 0x168   :  { %176 = shalt.err (!%p173_p7)
}
 0x169   :  { %s182_s23 = smov 128   ;;  %s183_s24 = smov 8  }
 0x16a   :  { %132 = dma.vmem_to_hbm [thread:$0]  %s127_s15, 256, %s222_s2, [#allocation3], %s182_s23, %s182_s23, %s183_s24  }
 0x16b   :  { %177 = dma.done.wait [#allocation3], 256  }
 0x16c   :  { %178 = vsyncadd [#allocation3], 4294967040 }
 0x16d   :  { %136 = vsyncpa [#allocation3], 1 }

</bundles_post_ra>
